<compile_context>
chip_gen: v7x
topology: tpu7x:2x2x1
jax: 0.10.0
libtpu: 0.0.40
codegen_flags: <defaults>
</compile_context>

<pallas_src>
import jax
import jax.numpy as jnp
from jax.experimental import pallas as pl
from jax.experimental.pallas import tpu as pltpu

_LANE = 128
_SUBLANE = 8


def _round_up(x, m):
    return (x + m - 1) // m * m


def _sigmoid(x):
    # exp on the EUP; approx reciprocal also lands on the EUP -> no VPU divide.
    return pl.reciprocal(1.0 + jnp.exp(-x), approx=True)


def _hw1net_kernel(x_ref, w1_ref, w2_ref, o_ref):
    # Layer 1: bias already folded into w1 via the augmented ones column of x.
    h = jnp.dot(x_ref[...], w1_ref[...], preferred_element_type=jnp.float32)
    h = _sigmoid(h)  # f32 activations

    # Layer 2: b2 is carried by the reserved hidden slot (value exactly 0.5,
    # matching W2 row = 2*b2). Only the matmul operand is narrowed to the
    # weight dtype (deliberate mixed precision); accumulation stays f32.
    y = jnp.dot(h.astype(w2_ref.dtype), w2_ref[...],
                preferred_element_type=jnp.float32)
    o_ref[...] = _sigmoid(y).astype(o_ref.dtype)


def hw1net_forward(x, w1, b1, w2, b2, *, matmul_dtype=jnp.float32, tile_n=512):
    """Pallas forward pass equivalent to hw1net:
        sigmoid(sigmoid(x @ w1.T + b1) @ w2.T + b2)

    x : (N, D_in) float32
    w1: (Hidden, D_in), b1: (Hidden,)   (PyTorch nn.Linear layout)
    w2: (D_out, Hidden), b2: (D_out,)
    returns (N, D_out) float32
    """
    n, d_in = x.shape
    hidden, _ = w1.shape
    d_out, _ = w2.shape

    # Padded / augmented dimensions (all lane dims -> multiples of 128).
    k1 = _round_up(d_in + 1, _LANE)      # x gets a ones column for b1
    h_p = _round_up(hidden + 1, _LANE)   # +1 reserved hidden slot carrying b2
    dout_p = _round_up(d_out, _LANE)

    # Batch tiling: pad rows to a multiple of the tile; grid over row-tiles.
    n_p = _round_up(max(n, _SUBLANE), _SUBLANE)
    tn = min(tile_n, n_p)
    n_p = _round_up(n_p, tn)
    grid = (n_p // tn,)

    # x_aug = [x | 1 | 0 ...]; zero-padded rows are sliced off at the end.
    xa = (jnp.zeros((n_p, k1), jnp.float32)
          .at[:n, :d_in].set(x.astype(jnp.float32))
          .at[:n, d_in].set(1.0))

    # W1_aug: rows [0:d_in] = W1.T, row d_in = b1. Column `hidden` stays all
    # zero so that hidden activation is sigmoid(0) == 0.5 exactly.
    w1a = (jnp.zeros((k1, h_p), jnp.float32)
           .at[:d_in, :hidden].set(w1.T)
           .at[d_in, :hidden].set(b1))

    # W2_aug: rows [0:hidden] = W2.T, row `hidden` = 2*b2 (0.5 * 2*b2 = b2).
    # Extra padded hidden rows are zero, so their 0.5 activations contribute 0.
    w2a = (jnp.zeros((h_p, dout_p), jnp.float32)
           .at[:hidden, :d_out].set(w2.T)
           .at[hidden, :d_out].set(2.0 * b2))

    # Narrow only the MXU operands (f32 by default; bf16 pays off for large N
    # on v6e/v7x). All elementwise math inside the kernel remains f32.
    xa = xa.astype(matmul_dtype)
    w1a = w1a.astype(matmul_dtype)
    w2a = w2a.astype(matmul_dtype)

    out = pl.pallas_call(
        _hw1net_kernel,
        out_shape=jax.ShapeDtypeStruct((n_p, dout_p), jnp.float32),
        grid=grid,
        in_specs=[
            pl.BlockSpec((tn, k1), lambda i: (i, 0)),        # batch-tiled input
            pl.BlockSpec((k1, h_p), lambda i: (0, 0)),       # resident weights
            pl.BlockSpec((h_p, dout_p), lambda i: (0, 0)),   # resident weights
        ],
        out_specs=pl.BlockSpec((tn, dout_p), lambda i: (i, 0)),  # lane-dense out
        compiler_params=pltpu.CompilerParams(
            dimension_semantics=("parallel",)),
    )(xa, w1a, w2a)

    # Strip batch/lane padding back to the logical shape.
    return out[:n, :d_out]


def reference_forward(x, w1, b1, w2, b2):
    h = jax.nn.sigmoid(x @ w1.T + b1)
    return jax.nn.sigmoid(h @ w2.T + b2)


if __name__ == "__main__":
    # Small shapes consistent with the module: D_in=32, Hidden=32, D_out=16, batch=8.
    N, D_in, Hidden, D_out = 8, 32, 32, 16

    key = jax.random.PRNGKey(0)
    kx, k1, kb1, k2, kb2 = jax.random.split(key, 5)

    x = jax.random.normal(kx, (N, D_in), dtype=jnp.float32)

    # Deterministic init mimicking nn.Linear's U(-1/sqrt(fan_in), 1/sqrt(fan_in)).
    lim1 = 1.0 / jnp.sqrt(jnp.float32(D_in))
    w1 = jax.random.uniform(k1, (Hidden, D_in), jnp.float32, -lim1, lim1)
    b1 = jax.random.uniform(kb1, (Hidden,), jnp.float32, -lim1, lim1)

    lim2 = 1.0 / jnp.sqrt(jnp.float32(Hidden))
    w2 = jax.random.uniform(k2, (D_out, Hidden), jnp.float32, -lim2, lim2)
    b2 = jax.random.uniform(kb2, (D_out,), jnp.float32, -lim2, lim2)

    out = hw1net_forward(x, w1, b1, w2, b2)
    out = jax.block_until_ready(out)

    ref = reference_forward(x, w1, b1, w2, b2)
    assert out.shape == (N, D_out)
    # Tolerance loosened vs 1e-5 because the sigmoid uses the EUP approx
    # reciprocal (per perf review); error is well below 2e-3 on sigmoid outputs.
    assert jnp.allclose(out, ref, atol=2e-3, rtol=2e-3), "mismatch vs reference"

    print("KERNEL_OK")
</pallas_src>

<mosaic_0001>
module attributes {stable_mosaic.version = 11 : i64} {
  func.func @_hw1net_kernel(%arg0: i32, %arg1: memref<8x128xf32, #tpu.memory_space<vmem>>, %arg2: memref<128x128xf32, #tpu.memory_space<vmem>>, %arg3: memref<128x128xf32, #tpu.memory_space<vmem>>, %arg4: memref<8x128xf32, #tpu.memory_space<vmem>>) attributes {dimension_semantics = [#tpu.dimension_semantics<parallel>], iteration_bounds = array<i64: 1>, scalar_prefetch = 0 : i64, scratch_operands = 0 : i64, tpu.core_type = #tpu.core_type<tc>, window_params = [{transform_indices = @transform_0, window_bounds = array<i64: 8, 128>}, {pipeline_mode = #tpu.pipeline_mode<synchronous>, transform_indices = @transform_1, window_bounds = array<i64: 128, 128>}, {pipeline_mode = #tpu.pipeline_mode<synchronous>, transform_indices = @transform_2, window_bounds = array<i64: 128, 128>}, {transform_indices = @transform_3, window_bounds = array<i64: 8, 128>}]} {
    %c0 = arith.constant 0 : index
    %c0_0 = arith.constant 0 : index
    %0 = vector.load %arg1[%c0, %c0_0] : memref<8x128xf32, #tpu.memory_space<vmem>>, vector<8x128xf32>
    %c0_1 = arith.constant 0 : index
    %c0_2 = arith.constant 0 : index
    %1 = vector.load %arg2[%c0_1, %c0_2] : memref<128x128xf32, #tpu.memory_space<vmem>>, vector<128x128xf32>
    %cst = arith.constant dense<0.000000e+00> : vector<8x128xf32>
    %2 = tpu.matmul %0, %1, %cst {dimension_numbers = #tpu.dot_dimension_numbers<[1], [0], [0], [1], [0, 0, 1, 1], [], []>} : vector<8x128xf32>, vector<128x128xf32>, vector<8x128xf32> -> vector<8x128xf32>
    %cst_3 = arith.constant 0.000000e+00 : f32
    %3 = vector.broadcast %cst_3 : f32 to vector<8x128xf32>
    %4 = arith.subf %3, %2 : vector<8x128xf32>
    %5 = math.exp %4 : vector<8x128xf32>
    %cst_4 = arith.constant 1.000000e+00 : f32
    %6 = vector.broadcast %cst_4 : f32 to vector<8x128xf32>
    %7 = arith.addf %6, %5 : vector<8x128xf32>
    %8 = tpu.reciprocal %7 {approx = true} : vector<8x128xf32> -> vector<8x128xf32>
    %c0_5 = arith.constant 0 : index
    %c0_6 = arith.constant 0 : index
    %9 = vector.load %arg3[%c0_5, %c0_6] : memref<128x128xf32, #tpu.memory_space<vmem>>, vector<128x128xf32>
    %cst_7 = arith.constant dense<0.000000e+00> : vector<8x128xf32>
    %10 = tpu.matmul %8, %9, %cst_7 {dimension_numbers = #tpu.dot_dimension_numbers<[1], [0], [0], [1], [0, 0, 1, 1], [], []>} : vector<8x128xf32>, vector<128x128xf32>, vector<8x128xf32> -> vector<8x128xf32>
    %cst_8 = arith.constant 0.000000e+00 : f32
    %11 = vector.broadcast %cst_8 : f32 to vector<8x128xf32>
    %12 = arith.subf %11, %10 : vector<8x128xf32>
    %13 = math.exp %12 : vector<8x128xf32>
    %cst_9 = arith.constant 1.000000e+00 : f32
    %14 = vector.broadcast %cst_9 : f32 to vector<8x128xf32>
    %15 = arith.addf %14, %13 : vector<8x128xf32>
    %16 = tpu.reciprocal %15 {approx = true} : vector<8x128xf32> -> vector<8x128xf32>
    %c0_10 = arith.constant 0 : index
    %c0_11 = arith.constant 0 : index
    %17 = vector.load %arg4[%c0_10, %c0_11] : memref<8x128xf32, #tpu.memory_space<vmem>>, vector<8x128xf32>
    tpu.vector_store %arg4[%c0_10, %c0_11], %16 {strides = array<i32>} : memref<8x128xf32, #tpu.memory_space<vmem>>, vector<8x128xf32>,
    return
  }
  func.func @transform_0(%arg0: i32) -> (i32, i32) {
    %c0_i32 = arith.constant 0 : i32
    %c0_i32_0 = arith.constant 0 : i32
    return %arg0, %c0_i32 : i32, i32
  }
  func.func @transform_1(%arg0: i32) -> (i32, i32) {
    %c0_i32 = arith.constant 0 : i32
    %c0_i32_0 = arith.constant 0 : i32
    %c0_i32_1 = arith.constant 0 : i32
    return %c0_i32, %c0_i32_0 : i32, i32
  }
  func.func @transform_2(%arg0: i32) -> (i32, i32) {
    %c0_i32 = arith.constant 0 : i32
    %c0_i32_0 = arith.constant 0 : i32
    %c0_i32_1 = arith.constant 0 : i32
    return %c0_i32, %c0_i32_0 : i32, i32
  }
  func.func @transform_3(%arg0: i32) -> (i32, i32) {
    %c0_i32 = arith.constant 0 : i32
    %c0_i32_0 = arith.constant 0 : i32
    return %arg0, %c0_i32 : i32, i32
  }
}

</mosaic_0001>

<bundles_post_ra>
// kernel: tpu_custom_call.1
= control target key start
LH: loop header
LB: loop body
LE: loop exit
PB: predicated region body
PF: predicated region fallthrough
CT: control target
= control target key end

     0   :  { %8 = vsyncpa [#allocation3], 0  ;;  %s616_s0 = inlined_call_operand.hbm [shape: f32[8,128], index: 0, kind: input, shape index: {}]   ;;  %s617_s1 = inlined_call_operand.hbm [shape: f32[128,128], index: 1, kind: input, shape index: {}]   ;;  %s618_s2 = inlined_call_operand.hbm [shape: f32[128,128], index: 2, kind: input, shape index: {}]   ;;  %s619_s3 = inlined_call_operand.hbm [shape: f32[8,128], index: 3, kind: output, shape index: {}]  }
   0x1   :  { %9 = vsyncpa [#allocation6], 0 }
   0x2   :  { %10 = vsyncpa [#allocation4], 0  ;;  %s517_s12 = smov [#allocation5]   ;;  %s423_s16 = scalar_lea.hbm %s617_s1, 2048 }
   0x3   :  { %s26_s13 = sshll.u32 %s517_s12, 4  ;;  %p424_p0 = scmp.ne.s32.totalorder %s617_s1, %s423_s16  ;;  %s27_s13 = int_to_ptr.vmem [resolvable:$true] %s26_s13 }
   0x4   :  { %p427_p1 = scmp.lt.u32.totalorder %s423_s16, %s617_s1 }
   0x6   :  { %p429_p2 = pnand %p427_p1, %p424_p0 }
   0x8   :  { %432 = shalt.err (!%p429_p2)
}
   0x9   :  { %s433_s21 = scalar_lea.vmem %s27_s13, 2048  ;;  %p438_p4 = scmp.lt.s32.totalorder %s27_s13, %s27_s13 }
   0xa   :  { %p434_p3 = scmp.ne.s32.totalorder %s27_s13, %s433_s21  ;;  %p439_p5 = scmp.lt.s32.totalorder %s433_s21, %s433_s21 }
   0xc   :  { %p440_p6 = por %p439_p5, %p438_p4 }
   0xe   :  { %p441_p7 = pnand %p440_p6, %p434_p3 }
  0x10   :  { %444 = shalt.err (!%p441_p7)
}
  0x11   :  { %s518_s22 = smov 128   ;;  %s519_s23 = smov 8  }
  0x12   :  { %32 = dma.hbm_to_vmem [thread:$0]  %s617_s1, 2048, %s27_s13, [#allocation6], %s518_s22, %s518_s22, %s519_s23  }
  0x13   :  { %s520_s26 = smov [#allocation2]   ;;  %s521_s28 = smov [#allocation7]  }
  0x14   :  { %s17_s27 = sshll.u32 %s520_s26, 4  ;;  %s38_s29 = sshll.u32 %s521_s28, 4  ;;  %s18_s27 = int_to_ptr.vmem [resolvable:$true] %s17_s27  ;;  %s39_s29 = int_to_ptr.vmem [resolvable:$true] %s38_s29 }
  0x15   :  { %s445_s5 = scalar_lea.hbm %s616_s0, 128 }
  0x16   :  { %p446_p8 = scmp.ne.s32.totalorder %s616_s0, %s445_s5  ;;  %p449_p9 = scmp.lt.u32.totalorder %s445_s5, %s616_s0 }
  0x18   :  { %p451_p10 = pnand %p449_p9, %p446_p8 }
  0x1a   :  { %454 = shalt.err (!%p451_p10)
}
  0x1b   :  { %s455_s1 = scalar_lea.vmem %s18_s27, 128  ;;  %p460_p12 = scmp.lt.s32.totalorder %s18_s27, %s18_s27 }
  0x1c   :  { %p456_p11 = scmp.ne.s32.totalorder %s18_s27, %s455_s1  ;;  %p461_p13 = scmp.lt.s32.totalorder %s455_s1, %s455_s1 }
  0x1e   :  { %p462_p0 = por %p461_p13, %p460_p12 }
  0x20   :  { %p463_p1 = pnand %p462_p0, %p456_p11 }
  0x22   :  { %466 = shalt.err (!%p463_p1)
}
  0x23   :  { %20 = dma.hbm_to_vmem [thread:$0]  %s616_s0, 128, %s18_s27, [#allocation3]  }
  0x24   :  { %s467_s14 = scalar_lea.hbm %s618_s2, 2048 }
  0x25   :  { %p468_p2 = scmp.ne.s32.totalorder %s618_s2, %s467_s14  ;;  %p471_p3 = scmp.lt.u32.totalorder %s467_s14, %s618_s2 }
  0x27   :  { %p473_p4 = pnand %p471_p3, %p468_p2 }
  0x29   :  { %476 = shalt.err (!%p473_p4)
}
  0x2a   :  { %s477_s19 = scalar_lea.vmem %s39_s29, 2048  ;;  %p482_p6 = scmp.lt.s32.totalorder %s39_s29, %s39_s29 }
  0x2b   :  { %p478_p5 = scmp.ne.s32.totalorder %s39_s29, %s477_s19  ;;  %p483_p7 = scmp.lt.s32.totalorder %s477_s19, %s477_s19 }
  0x2d   :  { %p484_p8 = por %p483_p7, %p482_p6 }
  0x2f   :  { %p485_p9 = pnand %p484_p8, %p478_p5 }
  0x31   :  { %488 = shalt.err (!%p485_p9)
}
  0x32   :  { %44 = dma.hbm_to_vmem [thread:$0]  %s618_s2, 2048, %s39_s29, [#allocation6], %s518_s22, %s518_s22, %s519_s23  }
  0x33   :  { %511 = dma.done.wait [#allocation3], 128  }
  0x34   :  { %512 = vsyncadd [#allocation3], 4294967168 }
  0x35   :  { %513 = dma.done.wait [#allocation6], 4096  }
  0x36   :  { %514 = vsyncadd [#allocation6], 4294963200  ;;  %v522_v0 = vmov 0.0|0.0   ;;  %vm523_vm0 = vmmov 0   ;;  %v524_v1 = vmov 0.0   ;;  %v55_v2 = vld [vmem:[#allocation5] sm:$0xff] }
  0x37   :  { %358 = vmatprep.subr.bf16.mxu0 %v522_v0  ;;  %320 = vmatprep.mubr.msk.f32.mxu0 %vm523_vm0, %v524_v1  ;;  %v56_v3 = vld [vmem:[#allocation5 + $0x8] sm:$0xff]  ;;  %v57_v4 = vld [vmem:[#allocation5 + $0x10] sm:$0xff]  ;;  %v58_v6 = vld [vmem:[#allocation5 + $0x18] sm:$0xff]  ;;  %s525_s2 = smov [#allocation8]  }
  0x38   :  { %382 = vmatprep.subr.bf16.mxu1 %v522_v0  ;;  %355 = vmatprep.mubr.msk.f32.mxu1 %vm523_vm0, %v524_v1  ;;  %v359_v5 = vpack.c.bf16 %v56_v3, %v55_v2  ;;  %v362_v7 = vpack.c.bf16 %v58_v6, %v57_v4  ;;  %v59_v8 = vld [vmem:[#allocation5 + $0x20] sm:$0xff]  ;;  %v60_v9 = vld [vmem:[#allocation5 + $0x28] sm:$0xff]  ;;  %v61_v14 = vld [vmem:[#allocation5 + $0x30] sm:$0xff]  ;;  %s244_s21 = sshll.u32 %s525_s2, 4  ;;  %s245_s21 = int_to_ptr.vmem [resolvable:$true] %s244_s21 }
  0x39   :  { %v146_v10 = vld [vmem:[#allocation7] sm:$0xff]  ;;  %v147_v11 = vld [vmem:[#allocation7 + $0x8] sm:$0xff]  ;;  %v365_v12 = vpack.c.bf16 %v60_v9, %v59_v8  ;;  %v62_v15 = vld [vmem:[#allocation5 + $0x38] sm:$0xff]  ;;  %s489_s22 = scalar_lea.vmem %s245_s21, 128  ;;  %p494_p11 = scmp.lt.s32.totalorder %s245_s21, %s245_s21 }
  0x3a   :  { %360 = vmatpush3.bf16.msra.mxu0 %v359_v5  ;;  %v383_v13 = vpack.c.bf16 %v147_v11, %v146_v10  ;;  %v368_v16 = vpack.c.bf16 %v62_v15, %v61_v14  ;;  %v63_v17 = vld [vmem:[#allocation5 + $0x40] sm:$0xff]  ;;  %v64_v18 = vld [vmem:[#allocation5 + $0x48] sm:$0xff]  ;;  %v65_v20 = vld [vmem:[#allocation5 + $0x50] sm:$0xff]  ;;  %p490_p10 = scmp.ne.s32.totalorder %s245_s21, %s489_s22  ;;  %p495_p12 = scmp.lt.s32.totalorder %s489_s22, %s489_s22 }
  0x3b   :  { %361 = vmatprep.subr.bf16.mxu0 %v522_v0  ;;  %v371_v19 = vpack.c.bf16 %v64_v18, %v63_v17  ;;  %v66_v21 = vld [vmem:[#allocation5 + $0x58] sm:$0xff]  ;;  %v67_v23 = vld [vmem:[#allocation5 + $0x60] sm:$0xff]  ;;  %v68_v24 = vld [vmem:[#allocation5 + $0x68] sm:$0xff] }
  0x3c   :  { %384 = vmatpush3.bf16.msra.mxu1 %v383_v13  ;;  %v374_v22 = vpack.c.bf16 %v66_v21, %v65_v20  ;;  %v377_v25 = vpack.c.bf16 %v68_v24, %v67_v23  ;;  %v69_v26 = vld [vmem:[#allocation5 + $0x70] sm:$0xff]  ;;  %v70_v27 = vld [vmem:[#allocation5 + $0x78] sm:$0xff]  ;;  %v150_v33 = vld [vmem:[#allocation7 + $0x20] sm:$0xff]  ;;  %p496_p13 = por %p495_p12, %p494_p11 }
  0x3d   :  { %385 = vmatprep.subr.bf16.mxu1 %v522_v0  ;;  %v380_v28 = vpack.c.bf16 %v70_v27, %v69_v26  ;;  %v54_v29 = vld [vmem:[#allocation2] sm:$0xff]  ;;  %v148_v30 = vld [vmem:[#allocation7 + $0x10] sm:$0xff]  ;;  %v151_v34 = vld [vmem:[#allocation7 + $0x28] sm:$0xff] }
  0x3e   :  { %363 = vmatpush3.bf16.msra.mxu0 %v362_v7  ;;  %v149_v31 = vld [vmem:[#allocation7 + $0x18] sm:$0xff]  ;;  %v389_v35 = vpack.c.bf16 %v151_v34, %v150_v33  ;;  %v152_v36 = vld [vmem:[#allocation7 + $0x30] sm:$0xff]  ;;  %v154_v39 = vld [vmem:[#allocation7 + $0x40] sm:$0xff]  ;;  %p497_p0 = pnand %p496_p13, %p490_p10 }
  0x3f   :  { %364 = vmatprep.subr.bf16.mxu0 %v522_v0  ;;  %v386_v32 = vpack.c.bf16 %v149_v31, %v148_v30  ;;  %v153_v37 = vld [vmem:[#allocation7 + $0x38] sm:$0xff]  ;;  %v155_v40 = vld [vmem:[#allocation7 + $0x48] sm:$0xff]  ;;  %v156_v42 = vld [vmem:[#allocation7 + $0x50] sm:$0xff] }
  0x40   :  { %v392_v38 = vpack.c.bf16 %v153_v37, %v152_v36  ;;  %v395_v41 = vpack.c.bf16 %v155_v40, %v154_v39  ;;  %v157_v43 = vld [vmem:[#allocation7 + $0x58] sm:$0xff]  ;;  %v158_v45 = vld [vmem:[#allocation7 + $0x60] sm:$0xff]  ;;  %v159_v46 = vld [vmem:[#allocation7 + $0x68] sm:$0xff] }
  0x41   :  { %387 = vmatpush3.bf16.msra.mxu1 %v386_v32  ;;  %v398_v44 = vpack.c.bf16 %v157_v43, %v156_v42  ;;  %v401_v47 = vpack.c.bf16 %v159_v46, %v158_v45  ;;  %v160_v48 = vld [vmem:[#allocation7 + $0x70] sm:$0xff]  ;;  %v161_v49 = vld [vmem:[#allocation7 + $0x78] sm:$0xff] }
  0x42   :  { %366 = vmatpush3.bf16.msra.mxu0 %v365_v12  ;;  %388 = vmatprep.subr.bf16.mxu1 %v522_v0  ;;  %v404_v50 = vpack.c.bf16 %v161_v49, %v160_v48 }
  0x43   :  { %367 = vmatprep.subr.bf16.mxu0 %v522_v0 }
  0x45   :  { %390 = vmatpush3.bf16.msra.mxu1 %v389_v35 }
  0x46   :  { %369 = vmatpush3.bf16.msra.mxu0 %v368_v16  ;;  %391 = vmatprep.subr.bf16.mxu1 %v522_v0 }
  0x47   :  { %370 = vmatprep.subr.bf16.mxu0 %v522_v0 }
  0x49   :  { %393 = vmatpush3.bf16.msra.mxu1 %v392_v38 }
  0x4a   :  { %372 = vmatpush3.bf16.msra.mxu0 %v371_v19  ;;  %394 = vmatprep.subr.bf16.mxu1 %v522_v0 }
  0x4b   :  { %373 = vmatprep.subr.bf16.mxu0 %v522_v0 }
  0x4d   :  { %396 = vmatpush3.bf16.msra.mxu1 %v395_v41 }
  0x4e   :  { %375 = vmatpush3.bf16.msra.mxu0 %v374_v22  ;;  %397 = vmatprep.subr.bf16.mxu1 %v522_v0 }
  0x4f   :  { %376 = vmatprep.subr.bf16.mxu0 %v522_v0 }
  0x51   :  { %399 = vmatpush3.bf16.msra.mxu1 %v398_v44 }
  0x52   :  { %378 = vmatpush3.bf16.msra.mxu0 %v377_v25  ;;  %400 = vmatprep.subr.bf16.mxu1 %v522_v0 }
  0x53   :  { %379 = vmatprep.subr.bf16.mxu0 %v522_v0 }
  0x55   :  { %402 = vmatpush3.bf16.msra.mxu1 %v401_v47 }
  0x56   :  { %381 = vmatpush3.bf16.msra.mxu0 %v380_v28  ;;  %403 = vmatprep.subr.bf16.mxu1 %v522_v0 }
  0x59   :  { %321 = vmatmul.mubr.f32.vlgmr.msra.gmra.mrb[0].mxu0 %v54_v29  ;;  %405 = vmatpush3.bf16.msra.mxu1 %v404_v50 }
 0x12c   :  { %v137_v51 = vpop.f32.mrb[0].mxu0 }
 0x12d   :  { %v141_v52 = vsub.f32 0.0, %v137_v51  ;;  %v322_v53 = vpop.f32.mrb[1].mxu0 }
 0x12f   :  { %v142_v54 = vmul.f32 1.442695, %v141_v52 }
 0x131   :  { %415 = vpow2.f32 %v142_v54 }
 0x13b   :  { %v416_v55 = vpop.eup %415 }
 0x13c   :  { %v144_v56 = vadd.f32 1.0, %v416_v55 }
 0x13e   :  { %417 = vrcp.f32 %v144_v56 }
 0x148   :  { %v418_v57 = vpop.eup %417 }
 0x149   :  { %356 = vmatmul.mubr.f32.vlgmr.msra.gmra.mrb[0].mxu1 %v418_v57 }
 0x21c   :  { %v228_v58 = vpop.f32.mrb[0].mxu1 }
 0x21d   :  { %v232_v59 = vsub.f32 0.0, %v228_v58  ;;  %v357_v60 = vpop.f32.mrb[1].mxu1 }
 0x21f   :  { %v233_v61 = vmul.f32 1.442695, %v232_v59 }
 0x221   :  { %419 = vpow2.f32 %v233_v61 }
 0x22b   :  { %v420_v62 = vpop.eup %419 }
 0x22c   :  { %v235_v63 = vadd.f32 1.0, %v420_v62 }
 0x22e   :  { %421 = vrcp.f32 %v235_v63 }
 0x238   :  { %v422_v0 = vpop.eup %421 }
 0x239   :  { %237 = vst [vmem:[#allocation8] sm:$0xff] %v422_v0 }
 0x23a   :  { %500 = shalt.err (!%p497_p0)
}
 0x23b   :  { %s501_s25 = scalar_lea.hbm %s619_s3, 128 }
 0x23c   :  { %p502_p1 = scmp.ne.s32.totalorder %s619_s3, %s501_s25  ;;  %p505_p2 = scmp.lt.u32.totalorder %s501_s25, %s619_s3 }
 0x23e   :  { %p507_p3 = pnand %p505_p2, %p502_p1 }
 0x240   :  { %510 = shalt.err (!%p507_p3)
}
 0x241   :  { %247 = dma.vmem_to_hbm [thread:$0]  %s245_s21, 128, %s619_s3, [#allocation4]  }
 0x242   :  { %515 = dma.done.wait [#allocation4], 128  }
 0x243   :  { %516 = vsyncadd [#allocation4], 4294967168 }
 0x244   :  { %251 = vsyncpa [#allocation3], 1 }
 0x245   :  { %252 = vsyncpa [#allocation6], 1 }
 0x246   :  { %253 = vsyncpa [#allocation4], 1 }

</bundles_post_ra>
